<compile_context>
chip_gen: v7x
topology: tpu7x:2x2x1
jax: 0.10.0
libtpu: 0.0.40
codegen_flags: <defaults>
</compile_context>

<pallas_src>
import jax
import jax.numpy as jnp
from jax.experimental import pallas as pl
from jax.experimental.pallas import tpu as pltpu


NUM_OUT = 84       # 4 box coords + 80 class scores (YOLOv5/COCO convention)
NUM_CLASSES = 80
NUM_BOX = 4


def _yolov5_nms_kernel(x_ref, wt_ref, bboxes_ref, scores_ref):
    # x_ref:      (C, TILE_N)   channels on sublanes, bboxes (N) on lanes
    # wt_ref:     (84, C)       rows 0:80 = score head, rows 80:84 = box head
    #                           with the xywh->xyxy decode pre-folded
    # bboxes_ref: (4,  TILE_N)
    # scores_ref: (80, TILE_N)
    out = jnp.dot(wt_ref[...], x_ref[...],
                  preferred_element_type=jnp.float32)            # (84, TILE_N)
    # Sublane slices: scores at offset 0 (aligned, 80 rows), boxes at offset 80
    # (8-aligned, 4 rows).  Both stores are fully lane-dense (TILE_N lanes).
    scores_ref[...] = out[:NUM_CLASSES, :].astype(scores_ref.dtype)
    bboxes_ref[...] = out[NUM_CLASSES:, :].astype(bboxes_ref.dtype)
    # TODO(synk): the torch `print(...)` debug side-effects are intentionally omitted.


def _choose_tile_n(n, tile_n_req, cap_rows):
    """Pick a lane-dense N tile, avoiding input padding whenever possible."""
    tile_max = max(128, min(tile_n_req, cap_rows))
    if n <= tile_max:
        return n, 0                      # one full-N block (always legal)
    t = (tile_max // 128) * 128
    while t >= 128:
        if n % t == 0:
            return t, 0                  # divisor of N, multiple of 128 -> no pad
        t -= 128
    # Fallback for awkward N: pad (one extra HBM copy of x + output slices).
    t = (tile_max // 128) * 128
    return t, (-n) % t


def yolov5_add_nms(x_bcn, w, *, tile_n=4096):
    """x_bcn: [B, C, N] (NCHW reshaped, N = H*W); w: [C, 84] 1x1-conv weight."""
    B, C, N = x_bcn.shape
    assert w.shape == (C, NUM_OUT)
    x_item = jnp.dtype(x_bcn.dtype).itemsize

    # Fold the xywh -> xyxy decode into the box head:
    #   [x1, y1, x2, y2] = [bx, by, bw, bh] @ M
    decode = jnp.array(
        [[1.0, 0.0, 1.0, 0.0],
         [0.0, 1.0, 0.0, 1.0],
         [-0.5, 0.0, 0.5, 0.0],
         [0.0, -0.5, 0.0, 0.5]], dtype=w.dtype)
    w_box = w[:, :NUM_BOX] @ decode                              # (C, 4)
    # Fuse both heads into one (84, C) weight: rows 0:80 scores, 80:84 boxes.
    wt = jnp.concatenate([w[:, NUM_BOX:], w_box], axis=1).T      # (84, C)
    wt = wt.astype(x_bcn.dtype)                                  # bf16 x -> bf16 w

    # Tile N.  Keep double-buffered (x + scores + boxes) blocks under ~24 MiB
    # so the tile is safe on v7x (64 MiB VMEM per TC) as well as v5e/v6e.
    bytes_per_row = 2 * (C * x_item + (NUM_CLASSES + NUM_BOX) * 4)
    cap_rows = (24 << 20) // bytes_per_row
    tile_n, pad = _choose_tile_n(N, tile_n, cap_rows)
    if pad:
        x_bcn = jnp.pad(x_bcn, ((0, 0), (0, 0), (0, pad)))
    n_padded = N + pad
    grid = (B, n_padded // tile_n)

    # Scoped-VMEM limit derived from the actual block bytes (+ weight + slack).
    w_bytes = NUM_OUT * max(C, 128) * jnp.dtype(wt.dtype).itemsize
    need = tile_n * bytes_per_row + 2 * w_bytes + (2 << 20)
    vmem_limit = int(min(max(need, 32 << 20), 48 << 20))

    cost = pl.CostEstimate(
        flops=2 * B * n_padded * C * NUM_OUT,
        transcendentals=0,
        bytes_accessed=B * n_padded * C * x_item
        + NUM_OUT * C * 4
        + B * n_padded * NUM_OUT * 4,
    )

    bboxes_cn, scores_cn = pl.pallas_call(
        _yolov5_nms_kernel,
        out_shape=(
            jax.ShapeDtypeStruct((B, NUM_BOX, n_padded), jnp.float32),
            jax.ShapeDtypeStruct((B, NUM_CLASSES, n_padded), jnp.float32),
        ),
        grid=grid,
        in_specs=[
            pl.BlockSpec((pl.Squeezed(), C, tile_n), lambda b, n: (b, 0, n)),
            pl.BlockSpec((NUM_OUT, C), lambda b, n: (0, 0)),
        ],
        out_specs=(
            pl.BlockSpec((pl.Squeezed(), NUM_BOX, tile_n), lambda b, n: (b, 0, n)),
            pl.BlockSpec((pl.Squeezed(), NUM_CLASSES, tile_n), lambda b, n: (b, 0, n)),
        ),
        compiler_params=pltpu.CompilerParams(
            dimension_semantics=("parallel", "parallel"),
            vmem_limit_bytes=vmem_limit,
        ),
        cost_estimate=cost,
    )(x_bcn, wt)

    if pad:
        bboxes_cn = bboxes_cn[:, :, :N]
        scores_cn = scores_cn[:, :, :N]

    # Only the small 84-wide outputs are transposed to the module's N-major
    # return layout; unsqueeze(2) is a free wrapper reshape.
    bboxes = jnp.transpose(bboxes_cn, (0, 2, 1))[:, :, None, :]   # (B, N, 1, 4)
    scores = jnp.transpose(scores_cn, (0, 2, 1))                  # (B, N, 80)
    return bboxes, scores


def _reference(x_bcn, w):
    out = jnp.einsum("bcn,co->bno", x_bcn, w)                     # [B, N, 84]
    bx, by, bw, bh = out[..., 0:1], out[..., 1:2], out[..., 2:3], out[..., 3:4]
    boxes = jnp.concatenate(
        [bx - bw / 2, by - bh / 2, bx + bw / 2, by + bh / 2], axis=-1)
    return boxes[:, :, None, :], out[..., 4:]


if __name__ == "__main__":
    B, C, H, W = 2, 4, 16, 16
    N = H * W

    key = jax.random.PRNGKey(0)
    kx, kw = jax.random.split(key)
    # Deterministic NCHW input, as PyTorch would see it.
    x_nchw = jax.random.normal(kx, (B, C, H, W), dtype=jnp.float32)
    # Deterministic synthetic "model" weight (1x1 conv over channels).
    w = jax.random.normal(kw, (C, NUM_OUT), dtype=jnp.float32) * 0.1

    # NCHW -> (B, C, N) is a pure metadata reshape (no transpose / HBM copy).
    x_bcn = x_nchw.reshape(B, C, H * W)

    bboxes, scores = yolov5_add_nms(x_bcn, w)
    jax.block_until_ready((bboxes, scores))

    ref_bboxes, ref_scores = _reference(x_bcn, w)
    assert bboxes.shape == (B, N, 1, NUM_BOX), bboxes.shape
    assert scores.shape == (B, N, NUM_CLASSES), scores.shape
    assert jnp.allclose(bboxes, ref_bboxes, atol=1e-4, rtol=1e-4)
    assert jnp.allclose(scores, ref_scores, atol=1e-4, rtol=1e-4)

    print("KERNEL_OK")
</pallas_src>

<mosaic_0001>
module attributes {stable_mosaic.version = 11 : i64} {
  func.func @_yolov5_nms_kernel(%arg0: i32, %arg1: i32, %arg2: memref<1x4x256xf32, #tpu.memory_space<vmem>>, %arg3: memref<84x4xf32, #tpu.memory_space<vmem>>, %arg4: memref<1x4x256xf32, #tpu.memory_space<vmem>>, %arg5: memref<1x80x256xf32, #tpu.memory_space<vmem>>) attributes {dimension_semantics = [#tpu.dimension_semantics<parallel>, #tpu.dimension_semantics<parallel>], iteration_bounds = array<i64: 2, 1>, scalar_prefetch = 0 : i64, scratch_operands = 0 : i64, tpu.core_type = #tpu.core_type<tc>, window_params = [{transform_indices = @transform_0, window_bounds = array<i64: 1, 4, 256>}, {pipeline_mode = #tpu.pipeline_mode<synchronous>, transform_indices = @transform_1, window_bounds = array<i64: 84, 4>}, {transform_indices = @transform_2, window_bounds = array<i64: 1, 4, 256>}, {transform_indices = @transform_3, window_bounds = array<i64: 1, 80, 256>}]} {
    %c0 = arith.constant 0 : index
    %c0_0 = arith.constant 0 : index
    %0 = vector.load %arg3[%c0, %c0_0] : memref<84x4xf32, #tpu.memory_space<vmem>>, vector<84x4xf32>
    %c0_1 = arith.constant 0 : index
    %c0_2 = arith.constant 0 : index
    %c0_3 = arith.constant 0 : index
    %1 = vector.load %arg2[%c0_1, %c0_2, %c0_3] : memref<1x4x256xf32, #tpu.memory_space<vmem>>, vector<1x4x256xf32>
    %2 = vector.shape_cast %1 : vector<1x4x256xf32> to vector<4x256xf32>
    %cst = arith.constant dense<0.000000e+00> : vector<84x256xf32>
    %3 = tpu.matmul %0, %2, %cst {dimension_numbers = #tpu.dot_dimension_numbers<[1], [0], [0], [1], [0, 0, 1, 1], [], []>} : vector<84x4xf32>, vector<4x256xf32>, vector<84x256xf32> -> vector<84x256xf32>
    %4 = vector.extract_strided_slice %3 {offsets = [0, 0], sizes = [80, 256], strides = [1, 1]} : vector<84x256xf32> to vector<80x256xf32>
    %c0_4 = arith.constant 0 : index
    %c0_5 = arith.constant 0 : index
    %c0_6 = arith.constant 0 : index
    %5 = vector.load %arg5[%c0_4, %c0_5, %c0_6] : memref<1x80x256xf32, #tpu.memory_space<vmem>>, vector<1x80x256xf32>
    %6 = vector.shape_cast %5 : vector<1x80x256xf32> to vector<80x256xf32>
    %7 = vector.shape_cast %4 : vector<80x256xf32> to vector<1x80x256xf32>
    tpu.vector_store %arg5[%c0_4, %c0_5, %c0_6], %7 {strides = array<i32>} : memref<1x80x256xf32, #tpu.memory_space<vmem>>, vector<1x80x256xf32>,
    %8 = vector.extract_strided_slice %3 {offsets = [80, 0], sizes = [4, 256], strides = [1, 1]} : vector<84x256xf32> to vector<4x256xf32>
    %c0_7 = arith.constant 0 : index
    %c0_8 = arith.constant 0 : index
    %c0_9 = arith.constant 0 : index
    %9 = vector.load %arg4[%c0_7, %c0_8, %c0_9] : memref<1x4x256xf32, #tpu.memory_space<vmem>>, vector<1x4x256xf32>
    %10 = vector.shape_cast %9 : vector<1x4x256xf32> to vector<4x256xf32>
    %11 = vector.shape_cast %8 : vector<4x256xf32> to vector<1x4x256xf32>
    tpu.vector_store %arg4[%c0_7, %c0_8, %c0_9], %11 {strides = array<i32>} : memref<1x4x256xf32, #tpu.memory_space<vmem>>, vector<1x4x256xf32>,
    return
  }
  func.func @transform_0(%arg0: i32, %arg1: i32) -> (i32, i32, i32) {
    %c0_i32 = arith.constant 0 : i32
    %c0_i32_0 = arith.constant 0 : i32
    return %arg0, %c0_i32, %arg1 : i32, i32, i32
  }
  func.func @transform_1(%arg0: i32, %arg1: i32) -> (i32, i32) {
    %c0_i32 = arith.constant 0 : i32
    %c0_i32_0 = arith.constant 0 : i32
    %c0_i32_1 = arith.constant 0 : i32
    return %c0_i32, %c0_i32_0 : i32, i32
  }
  func.func @transform_2(%arg0: i32, %arg1: i32) -> (i32, i32, i32) {
    %c0_i32 = arith.constant 0 : i32
    %c0_i32_0 = arith.constant 0 : i32
    return %arg0, %c0_i32, %arg1 : i32, i32, i32
  }
  func.func @transform_3(%arg0: i32, %arg1: i32) -> (i32, i32, i32) {
    %c0_i32 = arith.constant 0 : i32
    %c0_i32_0 = arith.constant 0 : i32
    return %arg0, %c0_i32, %arg1 : i32, i32, i32
  }
}

</mosaic_0001>

<bundles_post_ra>
// kernel: tpu_custom_call.1
= control target key start
LH: loop header
LB: loop body
LE: loop exit
PB: predicated region body
PF: predicated region fallthrough
CT: control target
= control target key end

     0   :  { %9 = vsyncpa [#allocation3], 0  ;;  %s1024_s0 = inlined_call_operand.vmem [shape: f32[2,4,256], index: 0, kind: input, shape index: {}]   ;;  %s1025_s1 = inlined_call_operand.vmem [shape: f32[84,4], index: 1, kind: input, shape index: {}]   ;;  %s1026_s2 = inlined_call_operand.hbm [shape: f32[2,4,256], index: 2, kind: output, shape index: {0}]   ;;  %s1027_s3 = inlined_call_operand.hbm [shape: f32[2,80,256], index: 3, kind: output, shape index: {1}]  }
   0x1   :  { %11 = vsyncpa [#allocation3 + $0x1], 0 }
   0x2   :  { %12 = vsyncpa [#allocation5], 0 }
   0x3   :  { %14 = vsyncpa [#allocation5 + $0x1], 0  ;;  %s808_s12 = smov 0   ;;  %s810_s13 = smov 0  }
   0x4   :  { %s812_s14 = smov 0   ;;  %s814_s15 = smov 0  }
   0x5   :  { %s816_s16 = smov 0   ;;  %s818_s17 = smov 0  }
   0x6 LB: > { %s574_s18 = sadd.s32 4294967295, %s781_s17   ;;  %s575_s19 = sadd.s32 4294967294, %s781_s17   ;;  %s781_s17 = sphi %s818_s17, %s20_s17   ;;  %s777_s16 = sphi %s816_s16, %s1034_s16   ;;  %s773_s15 = sphi %s814_s15, %s1033_s15   ;;  %s769_s14 = sphi %s812_s14, %s1032_s14   ;;  %s765_s13 = sphi %s810_s13, %s1031_s13   ;;  %s761_s12 = sphi %s808_s12, %s1030_s12  }
   0x7   : > { %s32_s20 = sadd.s32 1, %s777_s16  ;;  %s90_s21 = sadd.s32 1, %s769_s14 }
   0x8   : > { %p34_p0 = scmp.ge.s32.totalorder %s32_s20, 2  ;;  %p100_p1 = scmp.ne.s32.totalorder %s769_s14, %s765_s13 }
   0x9   : > { %p101_p2 = scmp.eq.s32.totalorder %s574_s18, 1  ;;  %p106_p3 = scmp.ne.s32.totalorder %s765_s13, %s761_s12 }
   0xa   : > { %s1036_s20 = smov (%p34_p0, %s32_s20), 0  ;;  %p107_p5 = scmp.eq.s32.totalorder %s575_s19, 1 }
   0xb   : > { %p848_p4 = por %p101_p2, %p100_p1  ;;  %s85_s23 = ssub.s32 %s777_s16, %s1036_s20 }
   0xc   : > { %p578_p6 = scmp.ge.s32.totalorder %s781_s17, 1  ;;  %p88_p7 = scmp.eq.s32.totalorder %s85_s23, 0 }
   0xd   : > { %p855_p8 = por %p107_p5, %p106_p3  ;;  %p169_p9 = scmp.lt.s32.totalorder %s781_s17, 3 }
   0xe   : > { %s861_s25 = scalar_select %p88_p7, %s769_s14, %s90_s21  }
   0xf   : > { %p170_p10 = pnand %p578_p6, %p169_p9 }
  0x10   : > { %p203_p11 = scmp.lt.s32.totalorder (!%p170_p10), %s773_s15, 1  ;;  %v783_v0 = vmov (!%p170_p10), 0.0   ;;  %vm262_vm0 = vcmask (!%p170_p10), 1043456   ;;  %v214_v3 = vld [vmem:[%s1025_s1] sm:$0xff] (!%p170_p10)  ;;  %vm228_vm1 = vcmask (!%p170_p10), 31744   ;;  %v220_v4 = vld [vmem:[%s1025_s1 + $0x30] sm:$0xff] (!%p170_p10) }
  0x11   : > { %173 = sbr.rel (%p170_p10) target bundleno = 303 (0x12f), region = 28  ;;  %331 = vmatprep.mubr.f32.mxu0 (!%p170_p10), %v783_v0  ;;  %367 = vmatprep.mubr.f32.mxu1 (!%p170_p10), %v783_v0  ;;  %v215_v5 = vld [vmem:[%s1025_s1 + $0x8] sm:$0xff] (!%p170_p10)  ;;  %v221_v6 = vld [vmem:[%s1025_s1 + $0x38] sm:$0xff] (!%p170_p10)  ;;  %v216_v7 = vld [vmem:[%s1025_s1 + $0x10] sm:$0xff] (!%p170_p10)  ;;  %s913_s9 = sand.u32 (!%p170_p10), 1, %s765_s13  }
  0x12   : > { %v222_v8 = vld [vmem:[%s1025_s1 + $0x40] sm:$0xff] (!%p170_p10)  ;;  %v217_v9 = vld [vmem:[%s1025_s1 + $0x18] sm:$0xff] (!%p170_p10)  ;;  %v223_v10 = vld [vmem:[%s1025_s1 + $0x48] sm:$0xff] (!%p170_p10)  ;;  %s605_s10 = smul.u32 (!%p170_p10), 160, %s913_s9  ;;  %s579_s18 = sshll.u32 (!%p170_p10), %s913_s9, 3 }
  0x13   : > { %v218_v11 = vld [vmem:[%s1025_s1 + $0x20] sm:$0xff] (!%p170_p10)  ;;  %v224_v12 = vld [vmem:[%s1025_s1 + $0x50] sm:$0xf] (!%p170_p10)  ;;  %v219_v13 = vld [vmem:[%s1025_s1 + $0x28] sm:$0xff] (!%p170_p10)  ;;  %s606_s19 = smul.u32 (!%p170_p10), 2560, %s773_s15  ;;  %s602_s21 = sshll.u32 (!%p170_p10), %s773_s15, 7 }
  0x14   : > { %s916_s11 = scalar_lea.vmem (!%p170_p10), [#allocation4], %s605_s10  ;;  %s194_s23 = scalar_lea.vmem (!%p170_p10), [#allocation2], %s579_s18 }
  0x15   : > { %s950_s5 = scalar_lea.hbm (!%p170_p10), %s1027_s3, %s606_s19  ;;  %s424_s6 = scalar_lea.sflag (!%p170_p10), [#allocation3], %s913_s9 }
  0x16   : > { %s784_s8 = smov (!%p170_p10), [#allocation2]  }
  0x17   : > { %s675_s10 = sshll.u32 (!%p170_p10), %s784_s8, 4  ;;  %s676_s10 = int_to_ptr.vmem [resolvable:$false] %s675_s10 }
  0x18   : > { %s204_s26 = scalar_select %p203_p11, %s773_s15, 1 }
  0x19   : > { %s677_s18 = scalar_lea.vmem %s676_s10, 256 }
  0x1a   : > { %s601_s27 = sshll.u32 %s204_s26, 3  ;;  %s445_s26 = sshll.u32 %s194_s23, 4  ;;  %s945_s26 = int_to_ptr.vmem [resolvable:$true] %s445_s26 }
  0x1b   : > { %s210_s30 = scalar_lea.vmem %s1024_s0, %s601_s27  ;;  %s460_s27 = sshll.u32 %s916_s11, 4  ;;  %s952_s27 = int_to_ptr.vmem [resolvable:$true] %s460_s27 }
  0x1c   : > { %v225_v1 = vld [vmem:[%s210_s30] sm:$0xff]  ;;  %s943_s30 = scalar_lea.hbm %s1026_s2, %s602_s21  ;;  %s671_s7 = scalar_lea.vmem %s945_s26, 128 }
  0x1d   : > { %v227_v2 = vcombine.high %v225_v1, %v225_v1  ;;  %p672_p12 = scmp.ne.s32.totalorder %s945_s26, %s671_s7  ;;  %p678_p1 = scmp.lt.s32.totalorder %s945_s26, %s676_s10 }
  0x1e   : > { %p679_p2 = scmp.lt.s32.totalorder %s677_s18, %s671_s7 }
  0x1f   : > { %582 = vmatprep.subr.msk.mxu0 %vm262_vm0, %v227_v2  ;;  %603 = vmatprep.subr.msk.mxu1 %vm262_vm0, %v227_v2  ;;  %p673_p13 = pnand %p672_p12, %p848_p4 }
  0x20   : > { %583 = vmatpush1.msk.msra.mxu0 %vm262_vm0, %v225_v1  ;;  %604 = vmatpush1.msk.msra.mxu1 %vm262_vm0, %v225_v1  ;;  %p680_p3 = por %p679_p2, %p678_p1 }
  0x21   : > { %584 = vmatmul.mubr.msk.f32.vlgmr.msra.gmra.mrb[0].mxu0 %vm228_vm1, %v214_v3  ;;  %590 = vmatmul.mubr.msk.f32.vlgmr.msra.gmra.mrb[0].mxu1 %vm228_vm1, %v220_v4  ;;  %p674_p0 = pneg %p673_p13 }
  0x22   : > { %337 = vmatprep.mubr.f32.mxu0 %v783_v0  ;;  %373 = vmatprep.mubr.f32.mxu1 %v783_v0 }
  0x23   : > { %p681_p5 = pnand %p680_p3, %p674_p0 }
  0x25   : > { %585 = vmatmul.mubr.msk.f32.gmra.mrb[2].mxu0 %vm228_vm1, %v215_v5  ;;  %591 = vmatmul.mubr.msk.f32.gmra.mrb[2].mxu1 %vm228_vm1, %v221_v6 }
  0x26   : > { %343 = vmatprep.mubr.f32.mxu0 %v783_v0  ;;  %379 = vmatprep.mubr.f32.mxu1 %v783_v0 }
  0x29   : > { %586 = vmatmul.mubr.msk.f32.gmra.mrb[4].mxu0 %vm228_vm1, %v216_v7  ;;  %592 = vmatmul.mubr.msk.f32.gmra.mrb[4].mxu1 %vm228_vm1, %v222_v8 }
  0x2a   : > { %349 = vmatprep.mubr.f32.mxu0 %v783_v0  ;;  %385 = vmatprep.mubr.f32.mxu1 %v783_v0 }
  0x2d   : > { %587 = vmatmul.mubr.msk.f32.gmra.mrb[6].mxu0 %vm228_vm1, %v217_v9  ;;  %593 = vmatmul.mubr.msk.f32.gmra.mrb[6].mxu1 %vm228_vm1, %v223_v10 }
  0x2e   : > { %355 = vmatprep.mubr.f32.mxu0 %v783_v0  ;;  %391 = vmatprep.mubr.f32.mxu1 %v783_v0 }
  0x31   : > { %588 = vmatmul.mubr.msk.f32.gmra.mrb[8].mxu0 %vm228_vm1, %v218_v11  ;;  %594 = vmatmul.mubr.msk.f32.gmra.mrb[8].mxu1 %vm228_vm1, %v224_v12 }
  0x32   : > { %361 = vmatprep.mubr.f32.mxu0 %v783_v0 }
  0x35   : > { %589 = vmatmul.mubr.msk.f32.gmra.mrb[10].mxu0 %vm228_vm1, %v219_v13 }
  0xf4   : > { %v333_v14 = vpop.f32.mrb[0].mxu0  ;;  %v369_v15 = vpop.f32.mrb[0].mxu1 }
  0xf5   : > { %398 = vst [vmem:[%s916_s11] sm:$0xff] %v333_v14  ;;  %v335_v16 = vpop.f32.mrb[1].mxu0  ;;  %410 = vst [vmem:[%s916_s11 + $0x60] sm:$0xff] %v369_v15  ;;  %v371_v17 = vpop.f32.mrb[1].mxu1 }
  0xf6   : > { %399 = vst [vmem:[%s916_s11 + $0x8] sm:$0xff] %v335_v16  ;;  %411 = vst [vmem:[%s916_s11 + $0x68] sm:$0xff] %v371_v17 }
  0xf8   : > { %v339_v18 = vpop.f32.mrb[2].mxu0  ;;  %v375_v19 = vpop.f32.mrb[2].mxu1 }
  0xf9   : > { %400 = vst [vmem:[%s916_s11 + $0x10] sm:$0xff] %v339_v18  ;;  %v341_v20 = vpop.f32.mrb[3].mxu0  ;;  %412 = vst [vmem:[%s916_s11 + $0x70] sm:$0xff] %v375_v19  ;;  %v377_v21 = vpop.f32.mrb[3].mxu1 }
  0xfa   : > { %401 = vst [vmem:[%s916_s11 + $0x18] sm:$0xff] %v341_v20  ;;  %413 = vst [vmem:[%s916_s11 + $0x78] sm:$0xff] %v377_v21 }
  0xfc   : > { %v345_v22 = vpop.f32.mrb[4].mxu0  ;;  %v381_v23 = vpop.f32.mrb[4].mxu1 }
  0xfd   : > { %402 = vst [vmem:[%s916_s11 + $0x20] sm:$0xff] %v345_v22  ;;  %v347_v24 = vpop.f32.mrb[5].mxu0  ;;  %414 = vst [vmem:[%s916_s11 + $0x80] sm:$0xff] %v381_v23  ;;  %v383_v25 = vpop.f32.mrb[5].mxu1 }
  0xfe   : > { %403 = vst [vmem:[%s916_s11 + $0x28] sm:$0xff] %v347_v24  ;;  %415 = vst [vmem:[%s916_s11 + $0x88] sm:$0xff] %v383_v25 }
 0x100   : > { %v351_v26 = vpop.f32.mrb[6].mxu0  ;;  %v387_v27 = vpop.f32.mrb[6].mxu1 }
 0x101   : > { %404 = vst [vmem:[%s916_s11 + $0x30] sm:$0xff] %v351_v26  ;;  %v353_v28 = vpop.f32.mrb[7].mxu0  ;;  %416 = vst [vmem:[%s916_s11 + $0x90] sm:$0xff] %v387_v27  ;;  %v389_v29 = vpop.f32.mrb[7].mxu1 }
 0x102   : > { %405 = vst [vmem:[%s916_s11 + $0x38] sm:$0xff] %v353_v28  ;;  %417 = vst [vmem:[%s916_s11 + $0x98] sm:$0xff] %v389_v29 }
 0x104   : > { %v357_v30 = vpop.f32.mrb[8].mxu0  ;;  %v393_v31 = vpop.f32.mrb[8].mxu1 }
 0x105   : > { %406 = vst [vmem:[%s916_s11 + $0x40] sm:$0xff] %v357_v30  ;;  %v359_v32 = vpop.f32.mrb[9].mxu0  ;;  %v395_v33 = vpop.f32.mrb[9].mxu1 }
 0x106   : > { %407 = vst [vmem:[%s916_s11 + $0x48] sm:$0xff] %v359_v32  ;;  %v420_v34 = vcombine.low %v393_v31, %v395_v33 }
 0x108   : > { %422 = vst [vmem:[%s194_s23] sm:$0xff] %v420_v34  ;;  %v363_v35 = vpop.f32.mrb[10].mxu0 }
 0x109   : > { %408 = vst [vmem:[%s916_s11 + $0x50] sm:$0xff] %v363_v35  ;;  %v365_v36 = vpop.f32.mrb[11].mxu0 }
 0x10a   : > { %684 = shalt.err (!%p681_p5)
}
 0x10b   : > { %s685_s19 = scalar_lea.hbm %s943_s30, 128  ;;  %s689_s28 = scalar_lea.hbm %s1026_s2, 256 }
 0x10c   : > { %p686_p6 = scmp.ne.s32.totalorder %s943_s30, %s685_s19  ;;  %p690_p10 = scmp.lt.u32.totalorder %s943_s30, %s1026_s2 }
 0x10d   : > { %p691_p11 = scmp.lt.u32.totalorder %s689_s28, %s685_s19  ;;  %p693_p13 = scmp.lt.u32.totalorder %s685_s19, %s943_s30 }
 0x10e   : > { %p687_p7 = pnand %p686_p6, %p848_p4 }
 0x10f   : > { %p692_p12 = por %p691_p11, %p690_p10 }
 0x110   : > { %p688_p9 = pneg %p687_p7 }
 0x111   : > { %p694_p0 = por %p693_p13, %p692_p12 }
 0x113   : > { %p695_p1 = pnand %p694_p0, %p688_p9 }
 0x115   : > { %698 = shalt.err (!%p695_p1)
}
 0x116   : > { %607 = dma.vmem_to_hbm [thread:$0]  (%p848_p4), %s945_s26, 128, %s943_s30, %s424_s6   ;;  %409 = vst [vmem:[%s916_s11 + $0x58] sm:$0xff] %v365_v36 }
 0x117   : > { %s429_s4 = scalar_lea.sflag [#allocation5], %s913_s9  ;;  %s699_s7 = scalar_lea.vmem %s952_s27, 2560 }
 0x118   : > { %p700_p2 = scmp.ne.s32.totalorder %s952_s27, %s699_s7  ;;  %s785_s8 = smov [#allocation4]  }
 0x119   : > { %s703_s10 = sshll.u32 %s785_s8, 4  ;;  %s704_s10 = int_to_ptr.vmem [resolvable:$false] %s703_s10 }
 0x11a   : > { %p701_p3 = pnand %p700_p2, %p848_p4  ;;  %s705_s18 = scalar_lea.vmem %s704_s10, 5120 }
 0x11b   : > { %p706_p6 = scmp.lt.s32.totalorder %s952_s27, %s704_s10  ;;  %p707_p7 = scmp.lt.s32.totalorder %s705_s18, %s699_s7 }
 0x11c   : > { %p702_p5 = pneg %p701_p3 }
 0x11d   : > { %p708_p9 = por %p707_p7, %p706_p6 }
 0x11f   : > { %p709_p10 = pnand %p708_p9, %p702_p5 }
 0x121   : > { %712 = shalt.err (!%p709_p10)
}
 0x122   : > { %s713_s11 = scalar_lea.hbm %s950_s5, 2560  ;;  %s717_s6 = scalar_lea.hbm %s1027_s3, 5120 }
 0x123   : > { %p714_p11 = scmp.ne.s32.totalorder %s950_s5, %s713_s11  ;;  %p718_p0 = scmp.lt.u32.totalorder %s950_s5, %s1027_s3 }
 0x124   : > { %p719_p1 = scmp.lt.u32.totalorder %s717_s6, %s713_s11  ;;  %p721_p3 = scmp.lt.u32.totalorder %s713_s11, %s950_s5 }
 0x125   : > { %p715_p12 = pnand %p714_p11, %p848_p4 }
 0x126   : > { %p720_p2 = por %p719_p1, %p718_p0 }
 0x127   : > { %p716_p13 = pneg %p715_p12 }
 0x128   : > { %p722_p5 = por %p721_p3, %p720_p2 }
 0x12a   : > { %p723_p6 = pnand %p722_p5, %p716_p13 }
 0x12c   : > { %726 = shalt.err (!%p723_p6)
}
 0x12d   : > { %s786_s23 = smov 256   ;;  %s787_s28 = smov 16  }
 0x12e   : > { %608 = dma.vmem_to_hbm [thread:$0]  (%p848_p4), %s952_s27, 2560, %s950_s5, %s429_s4, %s786_s23, %s786_s23, %s787_s28  }
 0x12f PF: > { %p618_p7 = scmp.ge.s32.totalorder %s781_s17, 2  ;;  %s475_s29 = sand.u32 1, %s761_s12  }
 0x130   : > { %s476_s15 = scalar_lea.sflag [#allocation3], %s475_s29 }
 0x131   : > { %p612_p9 = pnand %p618_p7, %p855_p8 }
 0x133   : > { %752 = dma.done.wait (!%p612_p9), %s476_s15, 128  }
 0x134   : > { %754 = vsyncadd (!%p612_p9), %s476_s15, 4294967168  ;;  %s485_s7 = scalar_lea.sflag [#allocation5], %s475_s29 }
 0x135   : > { %756 = dma.done.wait (!%p612_p9), %s485_s7, 2560  }
 0x136   : > { %758 = vsyncadd (!%p612_p9), %s485_s7, 4294964736  ;;  %s20_s17 = sadd.s32 1, %s781_s17   ;;  %s1030_s12 = smov %s765_s13 }
 0x137   : > { %p17_p10 = scmp.ge.s32.totalorder %s20_s17, 4   ;;  %s1031_s13 = smov %s769_s14 }
 0x138   : > { %s1032_s14 = smov %s861_s25  ;;  %s1033_s15 = smov %s777_s16 }
 0x139   : > { %s1034_s16 = smov %s1036_s20  ;;  %19 = sbr.rel (!%p17_p10) target bundleno = 6 (0x6), region = 80 }
 0x140   :  { %490 = vsyncpa [#allocation3], 1 }
 0x141   :  { %492 = vsyncpa [#allocation3 + $0x1], 1 }
 0x142   :  { %493 = vsyncpa [#allocation5], 1 }
 0x143   :  { %495 = vsyncpa [#allocation5 + $0x1], 1 }

</bundles_post_ra>
